<compile_context>
chip_gen: v7x
topology: tpu7x:2x2x1
jax: 0.10.0
libtpu: 0.0.40
codegen_flags: <defaults>
</compile_context>

<pallas_src>
import jax
import jax.numpy as jnp
from jax.experimental import pallas as pl
from jax.experimental.pallas import tpu as pltpu

_MiB = 1024 * 1024


# ----------------------------------------------------------------------------
# Helpers
# ----------------------------------------------------------------------------
def _round_up(a, b):
    return ((a + b - 1) // b) * b


def _cdiv(a, b):
    return (a + b - 1) // b


def _vmem_capacity_bytes():
    try:
        return int(pltpu.get_tpu_info().vmem_capacity_bytes)
    except Exception:
        return 64 * _MiB  # conservative (v7x per-TC VMEM)


def _est_vmem(tm, tff, d_model, is_gated, w_itemsize, out_itemsize, multi_k):
    """Estimate the kernel's VMEM working set for a (tm, tff) tile choice."""
    n_w = 3 if is_gated else 2                        # [W1|Wg] fused + W2 (or W1+W2)
    w = n_w * d_model * tff * w_itemsize * 2          # double-buffered weight slices
    xb = tm * d_model * w_itemsize * 2                # double-buffered x tile
    ob = tm * d_model * out_itemsize * 2              # double-buffered out tile
    acc = tm * d_model * 4 if multi_k else 0          # f32 accumulator (multi-k only)
    mid = tm * tff * 4 * (2 if is_gated else 1)       # f32 first-matmul intermediate
    bias = ((2 * tff if is_gated else tff) + d_model) * 4 * 2
    return w + xb + ob + acc + mid + bias


# ----------------------------------------------------------------------------
# One-time parameter preparation (hoisted out of the forward path)
# ----------------------------------------------------------------------------
def prepare_params(params, *, is_gated=False, compute_dtype=jnp.bfloat16,
                   block_ff=None, out_dtype=jnp.float32):
    """Pad / cast weights once and (for the gated variant) fuse [W1 | Wg]
    column-blockwise so each d_ff slice is a single MXU pass.

    Returns a dict that feed_forward() accepts directly; reuse it across calls
    so no per-call weight HBM copies are issued.
    """
    if compute_dtype is None:
        compute_dtype = jnp.bfloat16
    cd = jnp.dtype(compute_dtype)
    out_isz = jnp.dtype(out_dtype).itemsize

    w1 = jnp.asarray(params["w1"])
    d_model, d_ff = w1.shape
    d_ff_al = _round_up(d_ff, 128)

    vmem_cap = _vmem_capacity_bytes()
    budget = int(0.8 * vmem_cap)
    tm_cap = 1024 if vmem_cap >= 96 * _MiB else 512   # v5e/v6e : v7x

    if block_ff is not None:
        tff = max(128, _round_up(int(block_ff), 128))
    else:
        # Prefer full residency (nk == 1); shrink in 256-aligned steps only if
        # the tm_cap working set would not fit the VMEM budget.
        tff = d_ff_al
        while (_est_vmem(tm_cap, tff, d_model, is_gated, cd.itemsize, out_isz,
                         multi_k=(tff < d_ff_al)) > budget and tff > 256):
            tff = max(256, _round_up(tff // 2, 256))

    nk = _cdiv(d_ff, tff)
    d_ff_pad = nk * tff

    def pad_cols(a):
        return a if a.shape[1] == d_ff_pad else jnp.pad(
            a, ((0, 0), (0, d_ff_pad - a.shape[1])))

    def pad_rows(a):
        return a if a.shape[0] == d_ff_pad else jnp.pad(
            a, ((0, d_ff_pad - a.shape[0]), (0, 0)))

    def bias_or_zero(key, n):
        b = params.get(key, None)
        if b is None:
            return jnp.zeros((1, n), jnp.float32)
        return jnp.asarray(b, jnp.float32).reshape(1, -1)

    w1p = pad_cols(w1).astype(cd)
    b1p = pad_cols(bias_or_zero("b1", d_ff))
    w2p = pad_rows(jnp.asarray(params["w2"])).astype(cd)
    b2p = bias_or_zero("b2", d_model)

    if is_gated:
        wgp = pad_cols(jnp.asarray(params["wg"])).astype(cd)
        bgp = pad_cols(bias_or_zero("bg", d_ff))
        # Column-blockwise fusion: fused[:, k*2tff:(k+1)*2tff] = [W1_k | Wg_k]
        wf = jnp.concatenate(
            [w1p.reshape(d_model, nk, tff), wgp.reshape(d_model, nk, tff)],
            axis=2).reshape(d_model, nk * 2 * tff)
        bf = jnp.concatenate(
            [b1p.reshape(1, nk, tff), bgp.reshape(1, nk, tff)],
            axis=2).reshape(1, nk * 2 * tff)
    else:
        wf, bf = w1p, b1p

    return {
        "_prepared": True,
        "wf": wf, "bf": bf, "w2": w2p, "b2": b2p,
        "_meta": dict(d_model=d_model, d_ff=d_ff, d_ff_pad=d_ff_pad,
                      tff=tff, nk=nk, is_gated=bool(is_gated),
                      compute_dtype=cd, vmem_cap=vmem_cap, tm_cap=tm_cap),
    }


# ----------------------------------------------------------------------------
# Kernels
# ----------------------------------------------------------------------------
def _make_ffn_kernel(is_gated, multi_k):
    def _activated(x, wf, bf, tff, act_dtype):
        # h = x @ [W1 | Wg] (f32 MXU accumulation), bias add + ReLU in f32.
        h = jnp.dot(x, wf, preferred_element_type=jnp.float32) + bf
        if is_gated:
            # Gate product in the compute dtype: halves the (tm, tff)
            # intermediate's VMEM traffic on bf16-VPU parts (v6e/v7x).
            return (jnp.maximum(h[:, :tff], 0.0).astype(act_dtype)
                    * h[:, tff:].astype(act_dtype))
        return jnp.maximum(h, 0.0).astype(act_dtype)

    if multi_k:
        # 2-D grid (M tiles, d_ff tiles): f32 VMEM accumulator over k.
        def kernel(x_ref, wf_ref, bf_ref, w2_ref, b2_ref, o_ref, acc_ref):
            k = pl.program_id(1)

            @pl.when(k == 0)
            def _():
                acc_ref[...] = jnp.zeros_like(acc_ref)

            g = _activated(x_ref[...], wf_ref[...], bf_ref[...],
                           w2_ref.shape[0], w2_ref.dtype)
            acc_ref[...] += jnp.dot(g, w2_ref[...],
                                    preferred_element_type=jnp.float32)

            @pl.when(k == pl.num_programs(1) - 1)
            def _():
                o_ref[...] = (acc_ref[...] + b2_ref[...]).astype(o_ref.dtype)
    else:
        # 1-D grid over M with VMEM-resident weights: single fused pass.
        def kernel(x_ref, wf_ref, bf_ref, w2_ref, b2_ref, o_ref):
            g = _activated(x_ref[...], wf_ref[...], bf_ref[...],
                           w2_ref.shape[0], w2_ref.dtype)
            out = jnp.dot(g, w2_ref[...], preferred_element_type=jnp.float32)
            o_ref[...] = (out + b2_ref[...]).astype(o_ref.dtype)

    return kernel


# ----------------------------------------------------------------------------
# Wrapper
# ----------------------------------------------------------------------------
def feed_forward(x, params, *, is_gated=False, compute_dtype=None,
                 block_m=None, block_ff=None):
    """x: (batch, seq, d_model) -> (batch, seq, d_model) in x.dtype.

    `params` may be a raw param dict (prepared on the fly) or the result of
    prepare_params() (preferred: hoists weight pad/cast/fusion out of the
    forward path). Dropout is eval-mode identity.
    """
    if not params.get("_prepared", False):
        params = prepare_params(params, is_gated=is_gated,
                                compute_dtype=compute_dtype,
                                block_ff=block_ff, out_dtype=x.dtype)
    meta = params["_meta"]
    d_model = meta["d_model"]
    tff, nk = meta["tff"], meta["nk"]
    gated = meta["is_gated"]
    cd = meta["compute_dtype"]
    vmem_cap, tm_cap = meta["vmem_cap"], meta["tm_cap"]

    b, s, d_model_x = x.shape
    assert d_model_x == d_model, "x last dim must match d_model of params"
    m = b * s
    out_isz = jnp.dtype(x.dtype).itemsize
    budget = int(0.8 * vmem_cap)

    # --- M tile: large (shrunk last), 8-aligned -------------------------------
    if block_m is not None:
        tm = max(8, _round_up(int(block_m), 8))
    else:
        tm = min(tm_cap, _round_up(m, 8))
        while (_est_vmem(tm, tff, d_model, gated, cd.itemsize, out_isz,
                         multi_k=(nk > 1)) > budget and tm > 256):
            tm = max(256, _round_up(tm // 2, 8))
        if vmem_cap < 96 * _MiB:
            # 64 MiB part (v7x): two TensorCores share the "parallel" M axis;
            # make sure there are at least 2 M tiles when m is large enough.
            while _cdiv(m, tm) < 2 and tm > 256:
                tm = max(256, _round_up(tm // 2, 8))

    m_pad = _round_up(m, tm)
    m_tiles = m_pad // tm

    x2 = x.reshape(m, d_model).astype(cd)
    if m_pad != m:
        x2 = jnp.pad(x2, ((0, m_pad - m), (0, 0)))

    wf, bf, w2, b2 = params["wf"], params["bf"], params["w2"], params["b2"]
    w_cols = 2 * tff if gated else tff

    kernel = _make_ffn_kernel(gated, nk > 1)

    if nk > 1:
        grid = (m_tiles, nk)
        in_specs = [
            pl.BlockSpec((tm, d_model), lambda i, k: (i, 0)),
            pl.BlockSpec((d_model, w_cols), lambda i, k: (0, k)),
            pl.BlockSpec((1, w_cols), lambda i, k: (0, k)),
            pl.BlockSpec((tff, d_model), lambda i, k: (k, 0)),
            pl.BlockSpec((1, d_model), lambda i, k: (0, 0)),
        ]
        out_spec = pl.BlockSpec((tm, d_model), lambda i, k: (i, 0))
        scratch = [pltpu.VMEM((tm, d_model), jnp.float32)]
        dims = ("parallel", "arbitrary")
    else:
        # Weights have constant block indices across the M grid -> fetched once,
        # VMEM-resident for all M tiles; no accumulator scratch needed.
        grid = (m_tiles,)
        in_specs = [
            pl.BlockSpec((tm, d_model), lambda i: (i, 0)),
            pl.BlockSpec((d_model, w_cols), lambda i: (0, 0)),
            pl.BlockSpec((1, w_cols), lambda i: (0, 0)),
            pl.BlockSpec((tff, d_model), lambda i: (0, 0)),
            pl.BlockSpec((1, d_model), lambda i: (0, 0)),
        ]
        out_spec = pl.BlockSpec((tm, d_model), lambda i: (i, 0))
        scratch = []
        dims = ("parallel",)

    vmem_limit = min(int(0.95 * vmem_cap), 128 * _MiB)

    out2 = pl.pallas_call(
        kernel,
        out_shape=jax.ShapeDtypeStruct((m_pad, d_model), x.dtype),
        grid_spec=pltpu.PrefetchScalarGridSpec(
            num_scalar_prefetch=0,
            grid=grid,
            in_specs=in_specs,
            out_specs=out_spec,
            scratch_shapes=scratch,
        ),
        compiler_params=pltpu.CompilerParams(
            dimension_semantics=dims,
            vmem_limit_bytes=vmem_limit),
    )(x2, wf, bf, w2, b2)

    if m_pad != m:
        out2 = out2[:m]
    return out2.reshape(b, s, d_model)


# ----------------------------------------------------------------------------
# Reference + params
# ----------------------------------------------------------------------------
def init_params(key, d_model, d_ff, is_gated=False, dtype=jnp.float32):
    """Synthetic params; weights stored transposed vs torch.nn.Linear."""
    k1, k2, k3, k4, k5, k6 = jax.random.split(key, 6)
    s1 = 1.0 / jnp.sqrt(d_model)
    s2 = 1.0 / jnp.sqrt(d_ff)
    params = {
        "w1": jax.random.uniform(k1, (d_model, d_ff), dtype, -1, 1) * s1,
        "b1": jax.random.uniform(k2, (1, d_ff), dtype, -1, 1) * s1,
        "w2": jax.random.uniform(k3, (d_ff, d_model), dtype, -1, 1) * s2,
        "b2": jax.random.uniform(k4, (1, d_model), dtype, -1, 1) * s2,
    }
    if is_gated:
        params["wg"] = jax.random.uniform(k5, (d_model, d_ff), dtype, -1, 1) * s1
        params["bg"] = jax.random.uniform(k6, (1, d_ff), dtype, -1, 1) * s1
    return params


def feed_forward_ref(x, params, *, is_gated=False):
    """Pure-JAX reference (dropout in eval mode = identity)."""
    g = jnp.maximum(x @ params["w1"] + params["b1"][0], 0.0)
    if is_gated:
        g = g * (x @ params["wg"] + params["bg"][0])
    return g @ params["w2"] + params["b2"][0]


# ----------------------------------------------------------------------------
# Demo / correctness checks
# ----------------------------------------------------------------------------
if __name__ == "__main__":
    key = jax.random.PRNGKey(0)
    kx, kp, kx2, kp2 = jax.random.split(key, 4)

    # --- base shapes (small, module-consistent) ------------------------------
    batch, seq, d_model, d_ff = 2, 8, 32, 64
    x = jax.random.normal(kx, (batch, seq, d_model), jnp.float32)

    # non-gated, f32 compute, with hoisted prepare_params (reused twice)
    params = init_params(kp, d_model, d_ff, is_gated=False)
    prep = prepare_params(params, is_gated=False, compute_dtype=jnp.float32,
                          out_dtype=x.dtype)
    out = feed_forward(x, prep)
    jax.block_until_ready(out)
    out_again = feed_forward(x, prep)          # reuse prepared weights
    jax.block_until_ready(out_again)
    ref = feed_forward_ref(x, params, is_gated=False)
    assert out.shape == (batch, seq, d_model)
    assert jnp.allclose(out, ref, atol=1e-4, rtol=1e-4)
    assert jnp.allclose(out_again, ref, atol=1e-4, rtol=1e-4)

    # gated (fused [W1|Wg] single-pass, VMEM-resident weights), f32 compute
    params_g = init_params(kp, d_model, d_ff, is_gated=True)
    out_g = feed_forward(x, params_g, is_gated=True, compute_dtype=jnp.float32)
    jax.block_until_ready(out_g)
    ref_g = feed_forward_ref(x, params_g, is_gated=True)
    assert jnp.allclose(out_g, ref_g, atol=1e-4, rtol=1e-4)

    # default compute dtype (bf16 MXU inputs, f32 accumulation) — loose tol
    out_bf = feed_forward(x, params, is_gated=False)
    jax.block_until_ready(out_bf)
    assert jnp.allclose(out_bf, ref, atol=1e-1, rtol=1e-1)

    out_gbf = feed_forward(x, params_g, is_gated=True)
    jax.block_until_ready(out_gbf)
    assert jnp.allclose(out_gbf, ref_g, atol=2e-1, rtol=2e-1)

    # --- exercise the d_ff reduction axis (nk > 1), d_ff padding, ragged M ---
    b2_, s2_, dm2, dff2 = 3, 5, 128, 320        # m = 15 (ragged), d_ff pads to 384
    x_big = jax.random.normal(kx2, (b2_, s2_, dm2), jnp.float32)
    p_big = init_params(kp2, dm2, dff2, is_gated=True)
    out_big = feed_forward(x_big, p_big, is_gated=True,
                           compute_dtype=jnp.float32, block_ff=128)   # nk = 3
    jax.block_until_ready(out_big)
    ref_big = feed_forward_ref(x_big, p_big, is_gated=True)
    assert out_big.shape == (b2_, s2_, dm2)
    assert jnp.allclose(out_big, ref_big, atol=1e-3, rtol=1e-3)

    p_big_ng = init_params(kp2, dm2, dff2, is_gated=False)
    out_big_ng = feed_forward(x_big, p_big_ng, is_gated=False,
                              compute_dtype=jnp.float32, block_ff=128)
    jax.block_until_ready(out_big_ng)
    ref_big_ng = feed_forward_ref(x_big, p_big_ng, is_gated=False)
    assert jnp.allclose(out_big_ng, ref_big_ng, atol=1e-3, rtol=1e-3)

    print("KERNEL_OK")
</pallas_src>

<mosaic_0001>
module attributes {stable_mosaic.version = 11 : i64} {
  func.func @kernel(%arg0: i32, %arg1: memref<16x32xf32, #tpu.memory_space<vmem>>, %arg2: memref<32x128xf32, #tpu.memory_space<vmem>>, %arg3: memref<1x128xf32, #tpu.memory_space<vmem>>, %arg4: memref<128x32xf32, #tpu.memory_space<vmem>>, %arg5: memref<1x32xf32, #tpu.memory_space<vmem>>, %arg6: memref<16x32xf32, #tpu.memory_space<vmem>>) attributes {dimension_semantics = [#tpu.dimension_semantics<parallel>], iteration_bounds = array<i64: 1>, scalar_prefetch = 0 : i64, scratch_operands = 0 : i64, tpu.core_type = #tpu.core_type<tc>, window_params = [{transform_indices = @transform_0, window_bounds = array<i64: 16, 32>}, {pipeline_mode = #tpu.pipeline_mode<synchronous>, transform_indices = @transform_1, window_bounds = array<i64: 32, 128>}, {pipeline_mode = #tpu.pipeline_mode<synchronous>, transform_indices = @transform_2, window_bounds = array<i64: 1, 128>}, {pipeline_mode = #tpu.pipeline_mode<synchronous>, transform_indices = @transform_3, window_bounds = array<i64: 128, 32>}, {pipeline_mode = #tpu.pipeline_mode<synchronous>, transform_indices = @transform_4, window_bounds = array<i64: 1, 32>}, {transform_indices = @transform_5, window_bounds = array<i64: 16, 32>}]} {
    %c0 = arith.constant 0 : index
    %c0_0 = arith.constant 0 : index
    %0 = vector.load %arg1[%c0, %c0_0] : memref<16x32xf32, #tpu.memory_space<vmem>>, vector<16x32xf32>
    %c0_1 = arith.constant 0 : index
    %c0_2 = arith.constant 0 : index
    %1 = vector.load %arg2[%c0_1, %c0_2] : memref<32x128xf32, #tpu.memory_space<vmem>>, vector<32x128xf32>
    %c0_3 = arith.constant 0 : index
    %c0_4 = arith.constant 0 : index
    %2 = vector.load %arg3[%c0_3, %c0_4] : memref<1x128xf32, #tpu.memory_space<vmem>>, vector<1x128xf32>
    %cst = arith.constant dense<0.000000e+00> : vector<16x128xf32>
    %3 = tpu.matmul %0, %1, %cst {dimension_numbers = #tpu.dot_dimension_numbers<[1], [0], [0], [1], [0, 0, 1, 1], [], []>} : vector<16x32xf32>, vector<32x128xf32>, vector<16x128xf32> -> vector<16x128xf32>
    %4 = vector.broadcast %2 : vector<1x128xf32> to vector<16x128xf32>
    %5 = arith.addf %3, %4 : vector<16x128xf32>
    %cst_5 = arith.constant 0.000000e+00 : f32
    %6 = vector.broadcast %cst_5 : f32 to vector<16x128xf32>
    %7 = arith.maximumf %5, %6 : vector<16x128xf32>
    %c0_6 = arith.constant 0 : index
    %c0_7 = arith.constant 0 : index
    %8 = vector.load %arg4[%c0_6, %c0_7] : memref<128x32xf32, #tpu.memory_space<vmem>>, vector<128x32xf32>
    %cst_8 = arith.constant dense<0.000000e+00> : vector<16x32xf32>
    %9 = tpu.matmul %7, %8, %cst_8 {dimension_numbers = #tpu.dot_dimension_numbers<[1], [0], [0], [1], [0, 0, 1, 1], [], []>} : vector<16x128xf32>, vector<128x32xf32>, vector<16x32xf32> -> vector<16x32xf32>
    %c0_9 = arith.constant 0 : index
    %c0_10 = arith.constant 0 : index
    %10 = vector.load %arg5[%c0_9, %c0_10] : memref<1x32xf32, #tpu.memory_space<vmem>>, vector<1x32xf32>
    %11 = vector.broadcast %10 : vector<1x32xf32> to vector<16x32xf32>
    %12 = arith.addf %9, %11 : vector<16x32xf32>
    %c0_11 = arith.constant 0 : index
    %c0_12 = arith.constant 0 : index
    %13 = vector.load %arg6[%c0_11, %c0_12] : memref<16x32xf32, #tpu.memory_space<vmem>>, vector<16x32xf32>
    tpu.vector_store %arg6[%c0_11, %c0_12], %12 {strides = array<i32>} : memref<16x32xf32, #tpu.memory_space<vmem>>, vector<16x32xf32>,
    return
  }
  func.func @transform_0(%arg0: i32) -> (i32, i32) {
    %c0_i32 = arith.constant 0 : i32
    %c0_i32_0 = arith.constant 0 : i32
    return %arg0, %c0_i32 : i32, i32
  }
  func.func @transform_1(%arg0: i32) -> (i32, i32) {
    %c0_i32 = arith.constant 0 : i32
    %c0_i32_0 = arith.constant 0 : i32
    %c0_i32_1 = arith.constant 0 : i32
    return %c0_i32, %c0_i32_0 : i32, i32
  }
  func.func @transform_2(%arg0: i32) -> (i32, i32) {
    %c0_i32 = arith.constant 0 : i32
    %c0_i32_0 = arith.constant 0 : i32
    %c0_i32_1 = arith.constant 0 : i32
    return %c0_i32, %c0_i32_0 : i32, i32
  }
  func.func @transform_3(%arg0: i32) -> (i32, i32) {
    %c0_i32 = arith.constant 0 : i32
    %c0_i32_0 = arith.constant 0 : i32
    %c0_i32_1 = arith.constant 0 : i32
    return %c0_i32, %c0_i32_0 : i32, i32
  }
  func.func @transform_4(%arg0: i32) -> (i32, i32) {
    %c0_i32 = arith.constant 0 : i32
    %c0_i32_0 = arith.constant 0 : i32
    %c0_i32_1 = arith.constant 0 : i32
    return %c0_i32, %c0_i32_0 : i32, i32
  }
  func.func @transform_5(%arg0: i32) -> (i32, i32) {
    %c0_i32 = arith.constant 0 : i32
    %c0_i32_0 = arith.constant 0 : i32
    return %arg0, %c0_i32 : i32, i32
  }
}

</mosaic_0001>

<bundles_post_ra>
// kernel: tpu_custom_call.1
= control target key start
LH: loop header
LB: loop body
LE: loop exit
PB: predicated region body
PF: predicated region fallthrough
CT: control target
= control target key end

     0   :  { %vm34_vm0 = vcmask 261120   ;;  %s496_s0 = inlined_call_operand.vmem [shape: f32[16,32], index: 0, kind: input, shape index: {}]   ;;  %s497_s1 = inlined_call_operand.vmem [shape: f32[32,128], index: 1, kind: input, shape index: {}]   ;;  %s498_s2 = inlined_call_operand.vmem [shape: f32[1,128], index: 2, kind: input, shape index: {}]   ;;  %s499_s3 = inlined_call_operand.vmem [shape: f32[128,32], index: 3, kind: input, shape index: {}]   ;;  %s500_s4 = inlined_call_operand.vmem [shape: f32[1,32], index: 4, kind: input, shape index: {}]   ;;  %s501_s5 = inlined_call_operand.hbm [shape: f32[16,32], index: 5, kind: output, shape index: {}]  }
   0x1   :  { %v23_v0 = vld [vmem:[%s497_s1] sm:$0xff]  ;;  %v24_v1 = vld [vmem:[%s497_s1 + $0x8] sm:$0xff]  ;;  %v25_v2 = vld [vmem:[%s497_s1 + $0x10] sm:$0xff] }
   0x2   :  { %v308_v3 = vpack.c.bf16 %v24_v1, %v23_v0  ;;  %v26_v4 = vld [vmem:[%s497_s1 + $0x18] sm:$0xff]  ;;  %v21_v5 = vld [vmem:[%s496_s0] sm:$0xff]  ;;  %v119_v8 = vld [vmem:[%s499_s3 + $0x8] sm:$0xff] }
   0x3   :  { %v312_v6 = vpack.c.bf16 %v26_v4, %v25_v2  ;;  %270 = vmatprep.mubr.msk.f32.mxu0 %vm34_vm0, %v21_v5  ;;  %v118_v7 = vld [vmem:[%s499_s3] sm:$0xff]  ;;  %v120_v9 = vld [vmem:[%s499_s3 + $0x10] sm:$0xff]  ;;  %v121_v11 = vld [vmem:[%s499_s3 + $0x18] sm:$0xff] }
   0x4   :  { %309 = vmatprep.subr.bf16.mxu0 %v308_v3  ;;  %v316_v10 = vpack.c.bf16 %v119_v8, %v118_v7  ;;  %v320_v12 = vpack.c.bf16 %v121_v11, %v120_v9  ;;  %v122_v13 = vld [vmem:[%s499_s3 + $0x20] sm:$0xff]  ;;  %v123_v14 = vld [vmem:[%s499_s3 + $0x28] sm:$0xff] }
   0x5   :  { %311 = vmatpush3.bf16.msra.mxu0 %v308_v3 }
   0x6   :  { %313 = vmatprep.subr.bf16.mxu0 %v312_v6  ;;  %317 = vmatprep.subr.bf16.mxu1 %v316_v10 }
   0x7   :  { %319 = vmatpush3.bf16.msra.mxu1 %v316_v10 }
   0x8   :  { %10 = vsyncpa [#allocation3], 0  ;;  %321 = vmatprep.subr.bf16.mxu1 %v320_v12  ;;  %v324_v15 = vpack.c.bf16 %v123_v14, %v122_v13  ;;  %v22_v16 = vld [vmem:[%s496_s0 + $0x8] sm:$0xff]  ;;  %v124_v17 = vld [vmem:[%s499_s3 + $0x30] sm:$0xff] }
   0x9   :  { %315 = vmatpush3.bf16.msra.mxu0 %v312_v6  ;;  %v125_v18 = vld [vmem:[%s499_s3 + $0x38] sm:$0xff]  ;;  %v126_v20 = vld [vmem:[%s499_s3 + $0x40] sm:$0xff]  ;;  %v127_v21 = vld [vmem:[%s499_s3 + $0x48] sm:$0xff] }
   0xa   :  { %v328_v19 = vpack.c.bf16 %v125_v18, %v124_v17  ;;  %v332_v22 = vpack.c.bf16 %v127_v21, %v126_v20  ;;  %v128_v23 = vld [vmem:[%s499_s3 + $0x50] sm:$0xff]  ;;  %v129_v24 = vld [vmem:[%s499_s3 + $0x58] sm:$0xff]  ;;  %v130_v26 = vld [vmem:[%s499_s3 + $0x60] sm:$0xff] }
   0xb   :  { %323 = vmatpush3.bf16.msra.mxu1 %v320_v12  ;;  %v336_v25 = vpack.c.bf16 %v129_v24, %v128_v23  ;;  %v131_v27 = vld [vmem:[%s499_s3 + $0x68] sm:$0xff]  ;;  %v132_v29 = vld [vmem:[%s499_s3 + $0x70] sm:$0xff]  ;;  %v133_v30 = vld [vmem:[%s499_s3 + $0x78] sm:$0xff]  ;;  %s375_s3 = smov [#allocation2]  }
   0xc   :  { %271 = vmatmul.mubr.msk.f32.vlgmr.msra.gmra.mrb[0].mxu0 %vm34_vm0, %v22_v16  ;;  %325 = vmatprep.subr.bf16.mxu1 %v324_v15  ;;  %v340_v28 = vpack.c.bf16 %v131_v27, %v130_v26  ;;  %v344_v31 = vpack.c.bf16 %v133_v30, %v132_v29  ;;  %v234_v32 = vld [vmem:[%s498_s2] ss:$0 sm:$0xff]  ;;  %s223_s13 = sshll.u32 %s375_s3, 4  ;;  %s224_s13 = int_to_ptr.vmem [resolvable:$true] %s223_s13 }
   0xd   :  { %v237_v39 = vld [vmem:[%s500_s4] ss:$0 sm:$0xff]  ;;  %s351_s2 = scalar_lea.vmem %s224_s13, 256  ;;  %p356_p1 = scmp.lt.s32.totalorder %s224_s13, %s224_s13 }
   0xe   :  { %p352_p0 = scmp.ne.s32.totalorder %s224_s13, %s351_s2  ;;  %p357_p2 = scmp.lt.s32.totalorder %s351_s2, %s351_s2 }
   0xf   :  { %327 = vmatpush3.bf16.msra.mxu1 %v324_v15 }
  0x10   :  { %329 = vmatprep.subr.bf16.mxu1 %v328_v19  ;;  %p358_p3 = por %p357_p2, %p356_p1 }
  0x12   :  { %p359_p4 = pnand %p358_p3, %p352_p0 }
  0x13   :  { %331 = vmatpush3.bf16.msra.mxu1 %v328_v19 }
  0x14   :  { %333 = vmatprep.subr.bf16.mxu1 %v332_v22 }
  0x17   :  { %335 = vmatpush3.bf16.msra.mxu1 %v332_v22 }
  0x18   :  { %337 = vmatprep.subr.bf16.mxu1 %v336_v25 }
  0x1b   :  { %339 = vmatpush3.bf16.msra.mxu1 %v336_v25 }
  0x1c   :  { %341 = vmatprep.subr.bf16.mxu1 %v340_v28 }
  0x1f   :  { %343 = vmatpush3.bf16.msra.mxu1 %v340_v28 }
  0x20   :  { %345 = vmatprep.subr.bf16.mxu1 %v344_v31 }
  0x23   :  { %347 = vmatpush3.bf16.msra.mxu1 %v344_v31 }
  0xdf   :  { %v272_v33 = vpop.f32.mrb[0].mxu0 }
  0xe0   :  { %v113_v34 = vadd.f32 %v272_v33, %v234_v32  ;;  %v107_v35 = vpop.f32.mrb[1].mxu0 }
  0xe1   :  { %v108_v36 = vadd.f32 %v234_v32, %v107_v35 }
  0xe2   :  { %v117_v38 = vmax.f32 %v113_v34, 0.0 }
  0xe3   :  { %v116_v37 = vmax.f32 %v108_v36, 0.0 }
  0xe5   :  { %305 = vmatprep.mubr.f32.mxu1 %v116_v37 }
  0xe6   :  { %306 = vmatmul.mubr.f32.vlgmr.msra.gmra.mrb[0].mxu1 %v117_v38 }
 0x1b9   :  { %v307_v40 = vpop.f32.mrb[0].mxu1 }
 0x1ba   :  { %v213_v41 = vadd.f32 %v307_v40, %v237_v39  ;;  %v207_v42 = vpop.f32.mrb[1].mxu1 }
 0x1bb   :  { %v208_v43 = vadd.f32 %v237_v39, %v207_v42 }
 0x1bc   :  { %217 = vst.msk [vmem:[#allocation2 + $0x8] sm:$0xff] %vm34_vm0, %v213_v41 }
 0x1bd   :  { %216 = vst.msk [vmem:[#allocation2] sm:$0xff] %vm34_vm0, %v208_v43 }
 0x1be   :  { %362 = shalt.err (!%p359_p4)
}
 0x1bf   :  { %s363_s15 = scalar_lea.hbm %s501_s5, 256 }
 0x1c0   :  { %p364_p5 = scmp.ne.s32.totalorder %s501_s5, %s363_s15  ;;  %p367_p6 = scmp.lt.u32.totalorder %s363_s15, %s501_s5 }
 0x1c2   :  { %p369_p7 = pnand %p367_p6, %p364_p5 }
 0x1c4   :  { %372 = shalt.err (!%p369_p7)
}
 0x1c5   :  { %s376_s20 = smov 128   ;;  %s377_s21 = smov 8  }
 0x1c6   :  { %229 = dma.vmem_to_hbm [thread:$0]  %s224_s13, 256, %s501_s5, [#allocation3], %s376_s20, %s376_s20, %s377_s21  }
 0x1c7   :  { %373 = dma.done.wait [#allocation3], 256  }
 0x1c8   :  { %374 = vsyncadd [#allocation3], 4294967040 }
 0x1c9   :  { %233 = vsyncpa [#allocation3], 1 }

</bundles_post_ra>
